<compile_context>
chip_gen: v6e
topology: v6e:2x2x1
jax: 0.10.0
libtpu: 0.0.40
codegen_flags: <defaults>
</compile_context>

<pallas_src>
import jax
import jax.numpy as jnp
from jax.experimental import pallas as pl
from jax.experimental.pallas import tpu as pltpu


def _linear_relu_kernel(x_ref, w_ref, b_ref, o_ref):
    """One batch tile: o = relu(x @ w + b).

    x_ref: (TB, K)  activations (f32 or bf16); K = d_in or G*d_in
    w_ref: (K, N)   weight (dense or block-diagonal); N = d_out or G*d_out
    b_ref: (1, N)   bias (f32)
    o_ref: (TB, N)  output (f32 or bf16)
    """
    y = jnp.dot(x_ref[...], w_ref[...], preferred_element_type=jnp.float32)
    y = y + b_ref[...].astype(jnp.float32)   # f32 epilogue (v5e: no bf16 VPU)
    o_ref[...] = jnp.maximum(y, 0.0).astype(o_ref.dtype)


def classifier_forward(x, weight, bias, *, group=12, block_rows=49152,
                       compute_dtype=None, out_dtype=jnp.float32):
    """relu(x @ weight.T + bias), matching torch nn.Linear(10, 28) + F.relu.

    x:       (B, input_size)          f32 or bf16 (bf16 halves input HBM bytes)
    weight:  (class_num, input_size)  torch Linear convention
    bias:    (class_num,)
    group:   rows packed per logical row (12 = single MXU K-pass on all gens;
             24 is fine on v6e/v7x).
    out_dtype: jnp.bfloat16 halves the dominant output write stream.
    """
    B, d_in = x.shape
    d_out = weight.shape[0]

    if compute_dtype is None:
        compute_dtype = x.dtype           # do not force a wrapper-side cast
    x = x.astype(compute_dtype)

    # ---------------- tiny batch: one VMEM block, no grid, unpacked ----------
    if B < 8 * group:
        w_t = weight.T.astype(compute_dtype)                 # (d_in, d_out)
        b2 = bias.reshape(1, d_out).astype(jnp.float32)
        cost = pl.CostEstimate(
            flops=2 * B * d_in * d_out,
            transcendentals=0,
            bytes_accessed=4 * (B * d_in + d_in * d_out + d_out + B * d_out))
        return pl.pallas_call(
            _linear_relu_kernel,
            out_shape=jax.ShapeDtypeStruct((B, d_out), out_dtype),
            in_specs=[pl.BlockSpec(memory_space=pltpu.MemorySpace.VMEM)] * 3,
            out_specs=pl.BlockSpec(memory_space=pltpu.MemorySpace.VMEM),
            cost_estimate=cost,
        )(x, w_t, b2)

    # ---------------- packed path: G rows per logical row --------------------
    rows = pl.cdiv(B, group)              # packed rows
    b_pad = rows * group
    if b_pad != B:                        # pad remainder; rows are independent
        x = jnp.pad(x, ((0, b_pad - B), (0, 0)))

    kp = group * d_in                     # 120 for G=12
    np_ = group * d_out                   # 336 for G=12
    xp = x.reshape(rows, kp)              # free row-major view
    # Block-diagonal weight: kron(I_G, W^T) -> (G*d_in, G*d_out), tiny (~160 KB).
    w_blk = jnp.kron(jnp.eye(group, dtype=jnp.float32),
                     weight.T.astype(jnp.float32)).astype(compute_dtype)
    b_blk = jnp.tile(bias.astype(jnp.float32), group).reshape(1, np_)

    out_shape = jax.ShapeDtypeStruct((rows, np_), out_dtype)
    tbp = block_rows // group             # packed rows per grid step

    if tbp >= rows:
        # Whole packed problem fits one VMEM block: skip the grid entirely.
        out_p = pl.pallas_call(
            _linear_relu_kernel,
            out_shape=out_shape,
            in_specs=[pl.BlockSpec(memory_space=pltpu.MemorySpace.VMEM)] * 3,
            out_specs=pl.BlockSpec(memory_space=pltpu.MemorySpace.VMEM),
        )(xp, w_blk, b_blk)
    else:
        tbp = max(8, (tbp // 8) * 8)      # sublane-aligned batch tile
        grid = (pl.cdiv(rows, tbp),)      # partial last block handled by Pallas
        # VMEM/step (f32, lane-padded): x ~tbp*512 B + out ~tbp*1536 B,
        # double-buffered -> ~tbp*4 KiB.  Default tbp=4096 -> ~16 MiB, safe on
        # v7x (64 MiB phys); limit raised to 48 MiB for larger user tiles.
        out_p = pl.pallas_call(
            _linear_relu_kernel,
            out_shape=out_shape,
            grid=grid,
            in_specs=[
                pl.BlockSpec((tbp, kp), lambda i: (i, 0)),   # batch-tiled x
                pl.BlockSpec((kp, np_), lambda i: (0, 0)),   # weight resident (fetched once)
                pl.BlockSpec((1, np_), lambda i: (0, 0)),    # bias resident (fetched once)
            ],
            out_specs=pl.BlockSpec((tbp, np_), lambda i: (i, 0)),
            compiler_params=pltpu.CompilerParams(
                # "parallel" lets the batch axis shard across v7x's 2 TCs;
                # free on v5e/v6e (single TC).
                dimension_semantics=("parallel",),
                vmem_limit_bytes=48 * 1024 * 1024,
            ),
        )(xp, w_blk, b_blk)

    out = out_p.reshape(b_pad, d_out)     # free row-major view back to (B,28)
    return out if b_pad == B else out[:B]


if __name__ == "__main__":
    input_size = 10
    class_num = 28

    key = jax.random.PRNGKey(0)
    kx, kw, kb, kx2 = jax.random.split(key, 4)

    # Deterministic params (mimics torch Linear uniform(-1/sqrt(in), 1/sqrt(in)))
    bound = 1.0 / (input_size ** 0.5)
    weight = jax.random.uniform(kw, (class_num, input_size), jnp.float32,
                                minval=-bound, maxval=bound)
    bias = jax.random.uniform(kb, (class_num,), jnp.float32,
                              minval=-bound, maxval=bound)

    def ref_fn(xx):
        return jnp.maximum(xx.astype(jnp.float32) @ weight.T + bias, 0.0)

    # 1) Nominal small batch (module spec): single-block, no-grid, f32 path.
    x_small = jax.random.normal(kx, (2, input_size), jnp.float32)
    out_small = jax.block_until_ready(classifier_forward(x_small, weight, bias))
    assert out_small.shape == (2, class_num)
    assert jnp.allclose(out_small, ref_fn(x_small), atol=1e-4), "f32 small-batch mismatch"

    # 2) Packed + batch-tiled grid path, f32, with B not divisible by group or
    #    by the tile (exercises pad + partial last block).
    x_big = jax.random.normal(kx2, (4100, input_size), jnp.float32)
    out_big = jax.block_until_ready(
        classifier_forward(x_big, weight, bias, block_rows=1536))
    assert out_big.shape == (4100, class_num)
    assert jnp.allclose(out_big, ref_fn(x_big), atol=1e-4), "f32 packed/tiled mismatch"

    # 3) Packed single-block (no-grid) path with default block_rows.
    out_big2 = jax.block_until_ready(classifier_forward(x_big, weight, bias))
    assert jnp.allclose(out_big2, ref_fn(x_big), atol=1e-4), "f32 packed no-grid mismatch"

    # 4) bf16 activations + bf16 output (HBM-byte reduction on all gens);
    #    MXU accumulation and bias+ReLU epilogue remain f32 (v5e-safe).
    out_bf16 = jax.block_until_ready(
        classifier_forward(x_big.astype(jnp.bfloat16), weight, bias,
                           block_rows=1536, out_dtype=jnp.bfloat16))
    assert out_bf16.dtype == jnp.bfloat16
    assert jnp.allclose(out_bf16.astype(jnp.float32), ref_fn(x_big),
                        atol=1e-1, rtol=5e-2), "bf16 mismatch"

    print("KERNEL_OK")
</pallas_src>

<mosaic_0001>
module attributes {stable_mosaic.version = 11 : i64} {
  func.func @_linear_relu_kernel(%arg0: memref<2x10xf32, #tpu.memory_space<vmem>>, %arg1: memref<10x28xf32, #tpu.memory_space<vmem>>, %arg2: memref<1x28xf32, #tpu.memory_space<vmem>>, %arg3: memref<2x28xf32, #tpu.memory_space<vmem>>) attributes {dimension_semantics = [], scalar_prefetch = 0 : i64, scratch_operands = 0 : i64, tpu.core_type = #tpu.core_type<tc>} {
    %c0 = arith.constant 0 : index
    %c0_0 = arith.constant 0 : index
    %0 = vector.load %arg0[%c0, %c0_0] : memref<2x10xf32, #tpu.memory_space<vmem>>, vector<2x10xf32>
    %c0_1 = arith.constant 0 : index
    %c0_2 = arith.constant 0 : index
    %1 = vector.load %arg1[%c0_1, %c0_2] : memref<10x28xf32, #tpu.memory_space<vmem>>, vector<10x28xf32>
    %cst = arith.constant dense<0.000000e+00> : vector<2x28xf32>
    %2 = tpu.matmul %0, %1, %cst {dimension_numbers = #tpu.dot_dimension_numbers<[1], [0], [0], [1], [0, 0, 1, 1], [], []>} : vector<2x10xf32>, vector<10x28xf32>, vector<2x28xf32> -> vector<2x28xf32>
    %c0_3 = arith.constant 0 : index
    %c0_4 = arith.constant 0 : index
    %3 = vector.load %arg2[%c0_3, %c0_4] : memref<1x28xf32, #tpu.memory_space<vmem>>, vector<1x28xf32>
    %4 = vector.broadcast %3 : vector<1x28xf32> to vector<2x28xf32>
    %5 = arith.addf %2, %4 : vector<2x28xf32>
    %cst_5 = arith.constant 0.000000e+00 : f32
    %6 = vector.broadcast %cst_5 : f32 to vector<2x28xf32>
    %7 = arith.maximumf %5, %6 : vector<2x28xf32>
    %c0_6 = arith.constant 0 : index
    %c0_7 = arith.constant 0 : index
    %8 = vector.load %arg3[%c0_6, %c0_7] : memref<2x28xf32, #tpu.memory_space<vmem>>, vector<2x28xf32>
    tpu.vector_store %arg3[%c0_6, %c0_7], %7 {strides = array<i32>} : memref<2x28xf32, #tpu.memory_space<vmem>>, vector<2x28xf32>,
    return
  }
}

</mosaic_0001>

<bundles_post_ra>
// kernel: tpu_custom_call.1
= control target key start
LH: loop header
LB: loop body
LE: loop exit
PB: predicated region body
PF: predicated region fallthrough
CT: control target
= control target key end

     0   :  { %8 = vsyncpa [#allocation3], 0  ;;  %s273_s0 = inlined_call_operand.hbm [shape: f32[2,10], index: 0, kind: input, shape index: {}]   ;;  %s274_s1 = inlined_call_operand.hbm [shape: f32[10,28], index: 1, kind: input, shape index: {}]   ;;  %s275_s2 = inlined_call_operand.vmem [shape: f32[1,28], index: 2, kind: input, shape index: {}]   ;;  %s276_s3 = inlined_call_operand.hbm [shape: f32[2,28], index: 3, kind: output, shape index: {}]  }
   0x1   :  { %9 = vsyncpa [#allocation6], 0 }
   0x2   :  { %10 = vsyncpa [#allocation4], 0  ;;  %s234_s12 = smov [#allocation2]   ;;  %s235_s14 = smov [#allocation5]  }
   0x3   :  { %s17_s13 = sshll.u32 %s234_s12, 4  ;;  %s26_s15 = sshll.u32 %s235_s14, 4  ;;  %s18_s13 = int_to_ptr.vmem [resolvable:$true] %s17_s13  ;;  %s27_s15 = int_to_ptr.vmem [resolvable:$true] %s26_s15 }
   0x4   :  { %s176_s16 = scalar_lea.vmem %s18_s13, 32  ;;  %p181_p1 = scmp.lt.s32.totalorder %s18_s13, %s18_s13 }
   0x5   :  { %p177_p0 = scmp.ne.s32.totalorder %s18_s13, %s176_s16  ;;  %p182_p2 = scmp.lt.s32.totalorder %s176_s16, %s176_s16 }
   0x7   :  { %p183_p3 = por %p182_p2, %p181_p1 }
   0x9   :  { %p184_p4 = pnand %p183_p3, %p177_p0 }
   0xb   :  { %187 = shalt.err (!%p184_p4)
}
   0xc   :  { %20 = dma.hbm_to_vmem [thread:$0]  %s273_s0, 32, %s18_s13, [#allocation3]  }
   0xd   :  { %s196_s19 = scalar_lea.vmem %s27_s15, 256  ;;  %p201_p6 = scmp.lt.s32.totalorder %s27_s15, %s27_s15 }
   0xe   :  { %p197_p5 = scmp.ne.s32.totalorder %s27_s15, %s196_s19  ;;  %p202_p7 = scmp.lt.s32.totalorder %s196_s19, %s196_s19 }
  0x10   :  { %p203_p8 = por %p202_p7, %p201_p6 }
  0x12   :  { %p204_p9 = pnand %p203_p8, %p197_p5 }
  0x14   :  { %207 = shalt.err (!%p204_p9)
}
  0x15   :  { %s236_s20 = smov 128   ;;  %s237_s21 = smov 8  }
  0x16   :  { %32 = dma.hbm_to_vmem [thread:$0]  %s274_s1, 256, %s27_s15, [#allocation6], %s236_s20, %s236_s20, %s237_s21  }
  0x17   :  { %228 = dma.done.wait [#allocation3], 32  }
  0x18   :  { %229 = vsyncadd [#allocation3], 4294967264 }
  0x19   :  { %230 = dma.done.wait [#allocation6], 256  }
  0x1a   :  { %231 = vsyncadd [#allocation6], 4294967040  ;;  %v238_v0 = vmov 0.0   ;;  %vm239_vm0 = vmmov 0   ;;  %vm55_vm1 = vcmask 1041408   ;;  %v42_v2 = vld [vmem:[#allocation5] sm:$0xff] }
  0x1b   :  { %154 = vmatprep.subr.mxu0 %v238_v0  ;;  %158 = vmatprep.mubr.msk.f32.mxu0 %vm239_vm0, %v238_v0  ;;  %v43_v1 = vld [vmem:[#allocation5 + $0x8] sm:$0x3]  ;;  %v41_v3 = vld [vmem:[#allocation2] sm:$0x3]  ;;  %vm51_vm2 = vcmask 80896   ;;  %s240_s1 = smov [#allocation7]  }
  0x1c   :  { %155 = vmatpush3.msk.msra.mxu0 %vm55_vm1, %v43_v1  ;;  %v148_v4 = vld [vmem:[%s275_s2] ss:$0 sm:$0xff]  ;;  %s138_s25 = sshll.u32 %s240_s1, 4  ;;  %vm130_vm3 = vcmask 222208   ;;  %s139_s25 = int_to_ptr.vmem [resolvable:$true] %s138_s25 }
  0x1d   :  { %156 = vmatprep.subr.mxu0 %v238_v0  ;;  %s208_s26 = scalar_lea.vmem %s139_s25, 32  ;;  %p213_p11 = scmp.lt.s32.totalorder %s139_s25, %s139_s25 }
  0x1e   :  { %157 = vmatpush3.msra.mxu0 %v42_v2  ;;  %p209_p10 = scmp.ne.s32.totalorder %s139_s25, %s208_s26  ;;  %p214_p12 = scmp.lt.s32.totalorder %s208_s26, %s208_s26 }
  0x1f   :  { %159 = vmatmul.mubr.msk.f32.vlgmr.msra.gmra.mxu0 %vm51_vm2, %v41_v3 }
  0x20   :  { %p215_p13 = por %p214_p12, %p213_p11 }
  0x22   :  { %p216_p0 = pnand %p215_p13, %p209_p10 }
  0xdf   :  { %v125_v5 = vpop.f32.mrf.mxu0 }
  0xe0   :  { %v126_v6 = vadd.f32 %v148_v4, %v125_v5 }
  0xe1   :  { %v160_v7 = vpop.f32.mrf.mxu0 }
  0xe2   :  { %v129_v8 = vmax.f32 %v126_v6, 0.0 }
  0xe4   :  { %131 = vst.msk [vmem:[#allocation7] sm:$0x3] %vm130_vm3, %v129_v8 }
  0xe5   :  { %219 = shalt.err (!%p216_p0)
}
  0xe6   :  { %141 = dma.vmem_to_hbm [thread:$0]  %s139_s25, 32, %s276_s3, [#allocation4]  }
  0xe7   :  { %232 = dma.done.wait [#allocation4], 32  }
  0xe8   :  { %233 = vsyncadd [#allocation4], 4294967264 }
  0xe9   :  { %145 = vsyncpa [#allocation3], 1 }
  0xea   :  { %146 = vsyncpa [#allocation6], 1 }
  0xeb   :  { %147 = vsyncpa [#allocation4], 1 }

</bundles_post_ra>
